<compile_context>
chip_gen: v7x
topology: tpu7x:2x2x1
jax: 0.10.0
libtpu: 0.0.40
codegen_flags: <defaults>
</compile_context>

<pallas_src>
import functools
import math

import jax
import jax.numpy as jnp
from jax.experimental import pallas as pl
from jax.experimental.pallas import tpu as pltpu


NEG_SLOPE = 0.2
LANE = 128                                   # lane (last-dim) tile unit
_FUSED_WEIGHT_BUDGET = 20 * 1024 * 1024      # resident-weight budget for fusion
_VMEM_LIMIT_CAP = 48 * 1024 * 1024           # stay well under v7x's 64 MiB


def _round_up(x, m):
    return ((x + m - 1) // m) * m


def _sublane(dtype):
    # second-to-last-dim alignment: 8 for f32, 16 for bf16
    return 16 if jnp.dtype(dtype) == jnp.dtype(jnp.bfloat16) else 8


def _pick_tile(padded_dim, candidates):
    for c in candidates:
        if padded_dim % c == 0:
            return min(c, padded_dim)
    return padded_dim


# --------------------------- fused-stack kernel ---------------------------- #
def _fused_stack_kernel(x_ref, *refs, acts):
    """refs = (w_0, b_0, w_1, b_1, ..., o_ref).  Whole layer stack on one tile.

    Weights are in the compute dtype (bf16 or f32); bias/accumulation/
    activation are f32; output is f32.
    """
    n_layers = len(acts)
    o_ref = refs[-1]
    h = x_ref[...]
    for i in range(n_layers):
        w_ref = refs[2 * i]
        b_ref = refs[2 * i + 1]
        acc = jnp.dot(h, w_ref[...], preferred_element_type=jnp.float32)
        acc = acc + b_ref[...]                       # f32 bias broadcast
        if acts[i]:                                  # LeakyReLU(0.2) in f32
            acc = jnp.where(acc >= 0.0, acc, NEG_SLOPE * acc)
        if i < n_layers - 1:
            h = acc.astype(w_ref.dtype)              # keep MXU inputs narrow
        else:
            h = acc
    o_ref[...] = h.astype(o_ref.dtype)


def _fused_forward(x, weights, biases, acts, *, compute_dtype):
    """x: (M, in_planes) f32.  weights[i]: (K_i, N_i) padded+cast.
    biases[i]: (1, N_i) padded f32.  Returns (M_pad, N_last) f32."""
    M, K = x.shape
    K0 = weights[0].shape[0]
    N_last = weights[-1].shape[1]

    sub = _sublane(compute_dtype)
    # Large, aligned row tile derived from M (perf feedback), bounded by 512.
    tm = min(512, _round_up(M, sub))
    M_pad = _round_up(M, tm)

    x_p = jnp.pad(x, ((0, M_pad - M), (0, K0 - K))).astype(compute_dtype)

    in_specs = [pl.BlockSpec((tm, K0), lambda i: (i, 0))]
    operands = [x_p]
    for w, b in zip(weights, biases):
        kp, np_ = w.shape
        in_specs.append(pl.BlockSpec((kp, np_), lambda i: (0, 0)))   # resident
        in_specs.append(pl.BlockSpec((1, np_), lambda i: (0, 0)))    # resident
        operands.extend([w, b])

    itemsize = jnp.dtype(compute_dtype).itemsize
    resident = sum(w.size * w.dtype.itemsize + b.size * b.dtype.itemsize
                   for w, b in zip(weights, biases))
    flops = sum(2 * M_pad * w.shape[0] * w.shape[1] for w in weights)
    bytes_accessed = (x_p.size * itemsize + resident + M_pad * N_last * 4)
    # VMEM budget: double-buffered x/out tiles + resident params (v7x: 64 MiB).
    need = 2 * (tm * K0 * itemsize + tm * N_last * 4) + 2 * resident
    vmem_limit = int(min(max(2 * need, 32 * 1024 * 1024), _VMEM_LIMIT_CAP))

    kernel = functools.partial(_fused_stack_kernel,
                               acts=tuple(bool(a) for a in acts))
    return pl.pallas_call(
        kernel,
        out_shape=jax.ShapeDtypeStruct((M_pad, N_last), jnp.float32),
        grid_spec=pl.GridSpec(
            grid=(M_pad // tm,),
            in_specs=in_specs,
            out_specs=pl.BlockSpec((tm, N_last), lambda i: (i, 0)),
        ),
        compiler_params=pltpu.CompilerParams(
            dimension_semantics=("parallel",),       # feeds both v7x TCs
            vmem_limit_bytes=vmem_limit,
        ),
        cost_estimate=pl.CostEstimate(flops=int(flops), transcendentals=0,
                                      bytes_accessed=int(bytes_accessed)),
    )(*operands)


# ---------------- fallback: single layer, M/N tiled + K accumulator -------- #
def _linear_tiled_kernel(x_ref, w_ref, b_ref, o_ref, acc_ref, *, apply_act):
    k = pl.program_id(2)

    @pl.when(k == 0)
    def _init():
        acc_ref[...] = jnp.zeros_like(acc_ref)

    acc_ref[...] += jnp.dot(x_ref[...], w_ref[...],
                            preferred_element_type=jnp.float32)

    @pl.when(k == pl.num_programs(2) - 1)
    def _finish():
        y = acc_ref[...] + b_ref[...]
        if apply_act:
            y = jnp.where(y >= 0.0, y, NEG_SLOPE * y)
        o_ref[...] = y.astype(o_ref.dtype)


def _linear_tiled(x, w, b, *, apply_act, compute_dtype):
    """y = x @ w + b (+ optional LeakyReLU).  w: (K_pad, N_pad) padded+cast,
    b: (1, N_pad) f32.  Returns (M_pad, N_pad) f32."""
    M, K = x.shape
    Kp, Np = w.shape
    sub = _sublane(compute_dtype)

    tm = min(256, _round_up(M, sub))
    M_pad = _round_up(M, tm)
    tn = _pick_tile(Np, (256, 128))      # lane-dense output tile
    tk = _pick_tile(Kp, (512, 256, 128))

    x_p = jnp.pad(x, ((0, M_pad - M), (0, Kp - K))).astype(compute_dtype)

    itemsize = jnp.dtype(compute_dtype).itemsize
    flops = 2 * M_pad * Kp * Np
    bytes_accessed = (x_p.size * itemsize * (Np // tn)
                      + w.size * w.dtype.itemsize * (M_pad // tm)
                      + b.size * 4 + M_pad * Np * 4)

    kernel = functools.partial(_linear_tiled_kernel, apply_act=apply_act)
    return pl.pallas_call(
        kernel,
        out_shape=jax.ShapeDtypeStruct((M_pad, Np), jnp.float32),
        grid_spec=pltpu.PrefetchScalarGridSpec(
            num_scalar_prefetch=0,
            grid=(M_pad // tm, Np // tn, Kp // tk),
            in_specs=[
                pl.BlockSpec((tm, tk), lambda i, j, k: (i, k)),
                pl.BlockSpec((tk, tn), lambda i, j, k: (k, j)),
                pl.BlockSpec((1, tn), lambda i, j, k: (0, j)),
            ],
            out_specs=pl.BlockSpec((tm, tn), lambda i, j, k: (i, j)),
            scratch_shapes=[pltpu.VMEM((tm, tn), jnp.float32)],
        ),
        compiler_params=pltpu.CompilerParams(
            dimension_semantics=("parallel", "parallel", "arbitrary"),
            vmem_limit_bytes=_VMEM_LIMIT_CAP,
        ),
        cost_estimate=pl.CostEstimate(flops=int(flops), transcendentals=0,
                                      bytes_accessed=int(bytes_accessed)),
    )(x_p, w, b)


# ------------------------- Projection (parameters) ------------------------- #
def init_projection_params(key, in_planes, out_planes=None, n_layers=1):
    """Mirrors the PyTorch module's init:
       - weights: xavier_normal_ (std = sqrt(2 / (fan_in + fan_out)))
       - biases : PyTorch Linear default U(-1/sqrt(fan_in), 1/sqrt(fan_in))
    Weights are stored already transposed, (in_features, out_features), so the
    forward pass never pays a per-call transpose."""
    if out_planes is None:
        out_planes = in_planes
    params = []
    for i in range(n_layers):
        _in = in_planes if i == 0 else out_planes
        _out = out_planes
        key, kw, kb = jax.random.split(key, 3)
        std = math.sqrt(2.0 / (_in + _out))
        w = std * jax.random.normal(kw, (_in, _out), dtype=jnp.float32)
        bound = 1.0 / math.sqrt(_in)
        b = jax.random.uniform(kb, (1, _out), minval=-bound, maxval=bound,
                               dtype=jnp.float32)
        params.append((w, b))
    return params


def prepare_projection_params(params, compute_dtype=jnp.bfloat16):
    """One-time padding (feature dims -> multiples of 128) and dtype cast of
    the parameters, hoisted out of the forward pass."""
    weights, biases = [], []
    for w, b in params:
        k, n = w.shape
        kp, np_ = _round_up(k, LANE), _round_up(n, LANE)
        weights.append(jnp.pad(w, ((0, kp - k), (0, np_ - n)))
                       .astype(compute_dtype))
        biases.append(jnp.pad(b, ((0, 0), (0, np_ - n))).astype(jnp.float32))
    return {
        "weights": weights,
        "biases": biases,
        "in_planes": params[0][0].shape[0],
        "out_planes": params[-1][0].shape[1],
        "compute_dtype": compute_dtype,
    }


def projection_forward(prepared, x, *, layer_type=0,
                       max_fused_weight_bytes=_FUSED_WEIGHT_BUDGET):
    """Forward pass of Projection: Linear (+ LeakyReLU(0.2) between layers
    when layer_type > 1)."""
    weights, biases = prepared["weights"], prepared["biases"]
    cd = prepared["compute_dtype"]
    n_layers = len(weights)
    acts = tuple((i < n_layers - 1) and (layer_type > 1)
                 for i in range(n_layers))
    M = x.shape[0]

    resident = sum(w.size * w.dtype.itemsize + b.size * b.dtype.itemsize
                   for w, b in zip(weights, biases))
    if resident <= max_fused_weight_bytes:
        # Fused: one kernel for the whole stack, weights resident in VMEM.
        y = _fused_forward(x, weights, biases, acts, compute_dtype=cd)
    else:
        # Large projection: per-layer M/N tiled matmul with K accumulator.
        h = x
        for i, (w, b) in enumerate(zip(weights, biases)):
            h = _linear_tiled(h, w, b, apply_act=acts[i], compute_dtype=cd)
        y = h
    return y[:M, :prepared["out_planes"]]


# -------------------------------- reference -------------------------------- #
def projection_forward_ref(params, x, *, layer_type=0):
    n_layers = len(params)
    for i, (w, b) in enumerate(params):
        x = x @ w + b
        if (i < n_layers - 1) and (layer_type > 1):
            x = jnp.where(x >= 0.0, x, NEG_SLOPE * x)
    return x


if __name__ == "__main__":
    key = jax.random.PRNGKey(0)
    key, kx, kp = jax.random.split(key, 3)

    # Small shapes matching typical use of the module (projection head).
    batch, in_planes, out_planes = 8, 32, 32
    n_layers, layer_type = 2, 2              # Linear + LeakyReLU(0.2) + Linear

    x = jax.random.normal(kx, (batch, in_planes), dtype=jnp.float32)
    params = init_projection_params(kp, in_planes, out_planes, n_layers)
    y_ref = projection_forward_ref(params, x, layer_type=layer_type)

    # 1) exact-precision path (f32 compute) — fused kernel, tight tolerance.
    prep_f32 = prepare_projection_params(params, compute_dtype=jnp.float32)
    y32 = jax.block_until_ready(
        projection_forward(prep_f32, x, layer_type=layer_type))
    assert y32.shape == (batch, out_planes)
    assert jnp.allclose(y32, y_ref, atol=1e-4, rtol=1e-4)

    # 2) fast path (bf16 MXU inputs, f32 accumulation) — loose tolerance.
    prep_bf16 = prepare_projection_params(params, compute_dtype=jnp.bfloat16)
    y16 = jax.block_until_ready(
        projection_forward(prep_bf16, x, layer_type=layer_type))
    assert y16.shape == (batch, out_planes)
    assert jnp.allclose(y16, y_ref, atol=1e-1, rtol=5e-2)

    # 3) exercise the tiled fallback (M/N tiles + K accumulator + padding) by
    #    forcing it with max_fused_weight_bytes=0 at a moderate shape.
    key, kx2, kp2 = jax.random.split(key, 3)
    batch2, in2, out2 = 100, 384, 320
    x2 = jax.random.normal(kx2, (batch2, in2), dtype=jnp.float32)
    params2 = init_projection_params(kp2, in2, out2, n_layers=2)
    y2_ref = projection_forward_ref(params2, x2, layer_type=2)
    prep2 = prepare_projection_params(params2, compute_dtype=jnp.float32)
    y2 = jax.block_until_ready(
        projection_forward(prep2, x2, layer_type=2, max_fused_weight_bytes=0))
    assert y2.shape == (batch2, out2)
    assert jnp.allclose(y2, y2_ref, atol=1e-4, rtol=1e-4)

    print("KERNEL_OK")
</pallas_src>

<mosaic_0001>
module attributes {stable_mosaic.version = 11 : i64} {
  func.func @_fused_stack_kernel(%arg0: i32, %arg1: memref<8x128xf32, #tpu.memory_space<vmem>>, %arg2: memref<128x128xf32, #tpu.memory_space<vmem>>, %arg3: memref<1x128xf32, #tpu.memory_space<vmem>>, %arg4: memref<128x128xf32, #tpu.memory_space<vmem>>, %arg5: memref<1x128xf32, #tpu.memory_space<vmem>>, %arg6: memref<8x128xf32, #tpu.memory_space<vmem>>) attributes {dimension_semantics = [#tpu.dimension_semantics<parallel>], iteration_bounds = array<i64: 1>, scalar_prefetch = 0 : i64, scratch_operands = 0 : i64, tpu.core_type = #tpu.core_type<tc>, window_params = [{transform_indices = @transform_0, window_bounds = array<i64: 8, 128>}, {pipeline_mode = #tpu.pipeline_mode<synchronous>, transform_indices = @transform_1, window_bounds = array<i64: 128, 128>}, {pipeline_mode = #tpu.pipeline_mode<synchronous>, transform_indices = @transform_2, window_bounds = array<i64: 1, 128>}, {pipeline_mode = #tpu.pipeline_mode<synchronous>, transform_indices = @transform_3, window_bounds = array<i64: 128, 128>}, {pipeline_mode = #tpu.pipeline_mode<synchronous>, transform_indices = @transform_4, window_bounds = array<i64: 1, 128>}, {transform_indices = @transform_5, window_bounds = array<i64: 8, 128>}]} {
    %c0 = arith.constant 0 : index
    %c0_0 = arith.constant 0 : index
    %0 = vector.load %arg1[%c0, %c0_0] : memref<8x128xf32, #tpu.memory_space<vmem>>, vector<8x128xf32>
    %c0_1 = arith.constant 0 : index
    %c0_2 = arith.constant 0 : index
    %1 = vector.load %arg2[%c0_1, %c0_2] : memref<128x128xf32, #tpu.memory_space<vmem>>, vector<128x128xf32>
    %cst = arith.constant dense<0.000000e+00> : vector<8x128xf32>
    %2 = tpu.matmul %0, %1, %cst {dimension_numbers = #tpu.dot_dimension_numbers<[1], [0], [0], [1], [0, 0, 1, 1], [], []>} : vector<8x128xf32>, vector<128x128xf32>, vector<8x128xf32> -> vector<8x128xf32>
    %c0_3 = arith.constant 0 : index
    %c0_4 = arith.constant 0 : index
    %3 = vector.load %arg3[%c0_3, %c0_4] : memref<1x128xf32, #tpu.memory_space<vmem>>, vector<1x128xf32>
    %4 = vector.broadcast %3 : vector<1x128xf32> to vector<8x128xf32>
    %5 = arith.addf %2, %4 : vector<8x128xf32>
    %cst_5 = arith.constant 0.000000e+00 : f32
    %6 = vector.broadcast %cst_5 : f32 to vector<8x128xf32>
    %7 = arith.cmpf oge, %5, %6 : vector<8x128xf32>
    %cst_6 = arith.constant 2.000000e-01 : f32
    %8 = vector.broadcast %cst_6 : f32 to vector<8x128xf32>
    %9 = arith.mulf %8, %5 : vector<8x128xf32>
    %10 = arith.select %7, %5, %9 : vector<8x128xi1>, vector<8x128xf32>
    %c0_7 = arith.constant 0 : index
    %c0_8 = arith.constant 0 : index
    %11 = vector.load %arg4[%c0_7, %c0_8] : memref<128x128xf32, #tpu.memory_space<vmem>>, vector<128x128xf32>
    %cst_9 = arith.constant dense<0.000000e+00> : vector<8x128xf32>
    %12 = tpu.matmul %10, %11, %cst_9 {dimension_numbers = #tpu.dot_dimension_numbers<[1], [0], [0], [1], [0, 0, 1, 1], [], []>} : vector<8x128xf32>, vector<128x128xf32>, vector<8x128xf32> -> vector<8x128xf32>
    %c0_10 = arith.constant 0 : index
    %c0_11 = arith.constant 0 : index
    %13 = vector.load %arg5[%c0_10, %c0_11] : memref<1x128xf32, #tpu.memory_space<vmem>>, vector<1x128xf32>
    %14 = vector.broadcast %13 : vector<1x128xf32> to vector<8x128xf32>
    %15 = arith.addf %12, %14 : vector<8x128xf32>
    %c0_12 = arith.constant 0 : index
    %c0_13 = arith.constant 0 : index
    %16 = vector.load %arg6[%c0_12, %c0_13] : memref<8x128xf32, #tpu.memory_space<vmem>>, vector<8x128xf32>
    tpu.vector_store %arg6[%c0_12, %c0_13], %15 {strides = array<i32>} : memref<8x128xf32, #tpu.memory_space<vmem>>, vector<8x128xf32>,
    return
  }
  func.func @transform_0(%arg0: i32) -> (i32, i32) {
    %c0_i32 = arith.constant 0 : i32
    %c0_i32_0 = arith.constant 0 : i32
    return %arg0, %c0_i32 : i32, i32
  }
  func.func @transform_1(%arg0: i32) -> (i32, i32) {
    %c0_i32 = arith.constant 0 : i32
    %c0_i32_0 = arith.constant 0 : i32
    %c0_i32_1 = arith.constant 0 : i32
    return %c0_i32, %c0_i32_0 : i32, i32
  }
  func.func @transform_2(%arg0: i32) -> (i32, i32) {
    %c0_i32 = arith.constant 0 : i32
    %c0_i32_0 = arith.constant 0 : i32
    %c0_i32_1 = arith.constant 0 : i32
    return %c0_i32, %c0_i32_0 : i32, i32
  }
  func.func @transform_3(%arg0: i32) -> (i32, i32) {
    %c0_i32 = arith.constant 0 : i32
    %c0_i32_0 = arith.constant 0 : i32
    %c0_i32_1 = arith.constant 0 : i32
    return %c0_i32, %c0_i32_0 : i32, i32
  }
  func.func @transform_4(%arg0: i32) -> (i32, i32) {
    %c0_i32 = arith.constant 0 : i32
    %c0_i32_0 = arith.constant 0 : i32
    %c0_i32_1 = arith.constant 0 : i32
    return %c0_i32, %c0_i32_0 : i32, i32
  }
  func.func @transform_5(%arg0: i32) -> (i32, i32) {
    %c0_i32 = arith.constant 0 : i32
    %c0_i32_0 = arith.constant 0 : i32
    return %arg0, %c0_i32 : i32, i32
  }
}

</mosaic_0001>

<bundles_post_ra>
// kernel: tpu_custom_call.1
= control target key start
LH: loop header
LB: loop body
LE: loop exit
PB: predicated region body
PF: predicated region fallthrough
CT: control target
= control target key end

     0   :  { %10 = vsyncpa [#allocation3], 0  ;;  %s639_s0 = inlined_call_operand.hbm [shape: f32[8,128], index: 0, kind: input, shape index: {}]   ;;  %s640_s1 = inlined_call_operand.hbm [shape: f32[128,128], index: 1, kind: input, shape index: {}]   ;;  %s641_s2 = inlined_call_operand.vmem [shape: f32[1,128], index: 2, kind: input, shape index: {}]   ;;  %s642_s3 = inlined_call_operand.hbm [shape: f32[128,128], index: 3, kind: input, shape index: {}]   ;;  %s643_s4 = inlined_call_operand.vmem [shape: f32[1,128], index: 4, kind: input, shape index: {}]   ;;  %s644_s5 = inlined_call_operand.hbm [shape: f32[8,128], index: 5, kind: output, shape index: {}]  }
   0x1   :  { %11 = vsyncpa [#allocation6], 0 }
   0x2   :  { %12 = vsyncpa [#allocation4], 0  ;;  %s524_s18 = smov [#allocation5]   ;;  %s430_s22 = scalar_lea.hbm %s640_s1, 2048 }
   0x3   :  { %s28_s19 = sshll.u32 %s524_s18, 4  ;;  %p431_p0 = scmp.ne.s32.totalorder %s640_s1, %s430_s22  ;;  %s29_s19 = int_to_ptr.vmem [resolvable:$true] %s28_s19 }
   0x4   :  { %p434_p1 = scmp.lt.u32.totalorder %s430_s22, %s640_s1 }
   0x6   :  { %p436_p2 = pnand %p434_p1, %p431_p0 }
   0x8   :  { %439 = shalt.err (!%p436_p2)
}
   0x9   :  { %s440_s27 = scalar_lea.vmem %s29_s19, 2048  ;;  %p445_p4 = scmp.lt.s32.totalorder %s29_s19, %s29_s19 }
   0xa   :  { %p441_p3 = scmp.ne.s32.totalorder %s29_s19, %s440_s27  ;;  %p446_p5 = scmp.lt.s32.totalorder %s440_s27, %s440_s27 }
   0xc   :  { %p447_p6 = por %p446_p5, %p445_p4 }
   0xe   :  { %p448_p7 = pnand %p447_p6, %p441_p3 }
  0x10   :  { %451 = shalt.err (!%p448_p7)
}
  0x11   :  { %s525_s28 = smov 128   ;;  %s526_s29 = smov 8  }
  0x12   :  { %34 = dma.hbm_to_vmem [thread:$0]  %s640_s1, 2048, %s29_s19, [#allocation6], %s525_s28, %s525_s28, %s526_s29  }
  0x13   :  { %s527_s7 = smov [#allocation2]   ;;  %s528_s9 = smov [#allocation7]  }
  0x14   :  { %s19_s8 = sshll.u32 %s527_s7, 4  ;;  %s42_s10 = sshll.u32 %s528_s9, 4  ;;  %s20_s8 = int_to_ptr.vmem [resolvable:$true] %s19_s8  ;;  %s43_s10 = int_to_ptr.vmem [resolvable:$true] %s42_s10 }
  0x15   :  { %s452_s13 = scalar_lea.hbm %s639_s0, 128 }
  0x16   :  { %p453_p8 = scmp.ne.s32.totalorder %s639_s0, %s452_s13  ;;  %p456_p9 = scmp.lt.u32.totalorder %s452_s13, %s639_s0 }
  0x18   :  { %p458_p10 = pnand %p456_p9, %p453_p8 }
  0x1a   :  { %461 = shalt.err (!%p458_p10)
}
  0x1b   :  { %s462_s1 = scalar_lea.vmem %s20_s8, 128  ;;  %p467_p12 = scmp.lt.s32.totalorder %s20_s8, %s20_s8 }
  0x1c   :  { %p463_p11 = scmp.ne.s32.totalorder %s20_s8, %s462_s1  ;;  %p468_p13 = scmp.lt.s32.totalorder %s462_s1, %s462_s1 }
  0x1e   :  { %p469_p0 = por %p468_p13, %p467_p12 }
  0x20   :  { %p470_p1 = pnand %p469_p0, %p463_p11 }
  0x22   :  { %473 = shalt.err (!%p470_p1)
}
  0x23   :  { %22 = dma.hbm_to_vmem [thread:$0]  %s639_s0, 128, %s20_s8, [#allocation3]  }
  0x24   :  { %s474_s22 = scalar_lea.hbm %s642_s3, 2048 }
  0x25   :  { %p475_p2 = scmp.ne.s32.totalorder %s642_s3, %s474_s22  ;;  %p478_p3 = scmp.lt.u32.totalorder %s474_s22, %s642_s3 }
  0x27   :  { %p480_p4 = pnand %p478_p3, %p475_p2 }
  0x29   :  { %483 = shalt.err (!%p480_p4)
}
  0x2a   :  { %s484_s27 = scalar_lea.vmem %s43_s10, 2048  ;;  %p489_p6 = scmp.lt.s32.totalorder %s43_s10, %s43_s10 }
  0x2b   :  { %p485_p5 = scmp.ne.s32.totalorder %s43_s10, %s484_s27  ;;  %p490_p7 = scmp.lt.s32.totalorder %s484_s27, %s484_s27 }
  0x2d   :  { %p491_p8 = por %p490_p7, %p489_p6 }
  0x2f   :  { %p492_p9 = pnand %p491_p8, %p485_p5 }
  0x31   :  { %495 = shalt.err (!%p492_p9)
}
  0x32   :  { %48 = dma.hbm_to_vmem [thread:$0]  %s642_s3, 2048, %s43_s10, [#allocation6], %s525_s28, %s525_s28, %s526_s29  }
  0x33   :  { %518 = dma.done.wait [#allocation3], 128  }
  0x34   :  { %519 = vsyncadd [#allocation3], 4294967168 }
  0x35   :  { %520 = dma.done.wait [#allocation6], 4096  }
  0x36   :  { %521 = vsyncadd [#allocation6], 4294963200  ;;  %v529_v0 = vmov 0.0|0.0   ;;  %vm530_vm0 = vmmov 0   ;;  %v531_v1 = vmov 0.0   ;;  %v61_v2 = vld [vmem:[#allocation5] sm:$0xff] }
  0x37   :  { %373 = vmatprep.subr.bf16.mxu0 %v529_v0  ;;  %335 = vmatprep.mubr.msk.f32.mxu0 %vm530_vm0, %v531_v1  ;;  %v62_v3 = vld [vmem:[#allocation5 + $0x8] sm:$0xff]  ;;  %v63_v4 = vld [vmem:[#allocation5 + $0x10] sm:$0xff]  ;;  %v64_v6 = vld [vmem:[#allocation5 + $0x18] sm:$0xff]  ;;  %s532_s7 = smov [#allocation8]  }
  0x38   :  { %397 = vmatprep.subr.bf16.mxu1 %v529_v0  ;;  %370 = vmatprep.mubr.msk.f32.mxu1 %vm530_vm0, %v531_v1  ;;  %v374_v5 = vpack.c.bf16 %v62_v3, %v61_v2  ;;  %v377_v7 = vpack.c.bf16 %v64_v6, %v63_v4  ;;  %v65_v8 = vld [vmem:[#allocation5 + $0x20] sm:$0xff]  ;;  %v66_v9 = vld [vmem:[#allocation5 + $0x28] sm:$0xff]  ;;  %v159_v12 = vld [vmem:[#allocation7 + $0x10] sm:$0xff]  ;;  %s257_s8 = sshll.u32 %s532_s7, 4  ;;  %s258_s8 = int_to_ptr.vmem [resolvable:$true] %s257_s8 }
  0x39   :  { %v157_v10 = vld [vmem:[#allocation7] sm:$0xff]  ;;  %v158_v11 = vld [vmem:[#allocation7 + $0x8] sm:$0xff]  ;;  %v160_v13 = vld [vmem:[#allocation7 + $0x18] sm:$0xff]  ;;  %v380_v14 = vpack.c.bf16 %v66_v9, %v65_v8  ;;  %s496_s9 = scalar_lea.vmem %s258_s8, 128  ;;  %p501_p11 = scmp.lt.s32.totalorder %s258_s8, %s258_s8 }
  0x3a   :  { %375 = vmatpush3.bf16.msra.mxu0 %v374_v5  ;;  %v398_v15 = vpack.c.bf16 %v158_v11, %v157_v10  ;;  %v67_v16 = vld [vmem:[#allocation5 + $0x30] sm:$0xff]  ;;  %v68_v17 = vld [vmem:[#allocation5 + $0x38] sm:$0xff]  ;;  %v401_v18 = vpack.c.bf16 %v160_v13, %v159_v12  ;;  %v161_v19 = vld [vmem:[#allocation7 + $0x20] sm:$0xff]  ;;  %p497_p10 = scmp.ne.s32.totalorder %s258_s8, %s496_s9  ;;  %p502_p12 = scmp.lt.s32.totalorder %s496_s9, %s496_s9 }
  0x3b   :  { %376 = vmatprep.subr.bf16.mxu0 %v529_v0  ;;  %v162_v20 = vld [vmem:[#allocation7 + $0x28] sm:$0xff]  ;;  %v383_v21 = vpack.c.bf16 %v68_v17, %v67_v16  ;;  %v69_v22 = vld [vmem:[#allocation5 + $0x40] sm:$0xff]  ;;  %v163_v25 = vld [vmem:[#allocation7 + $0x30] sm:$0xff] }
  0x3c   :  { %399 = vmatpush3.bf16.msra.mxu1 %v398_v15  ;;  %v70_v23 = vld [vmem:[#allocation5 + $0x48] sm:$0xff]  ;;  %v404_v24 = vpack.c.bf16 %v162_v20, %v161_v19  ;;  %v164_v26 = vld [vmem:[#allocation7 + $0x38] sm:$0xff]  ;;  %v71_v28 = vld [vmem:[#allocation5 + $0x50] sm:$0xff]  ;;  %p503_p13 = por %p502_p12, %p501_p11 }
  0x3d   :  { %400 = vmatprep.subr.bf16.mxu1 %v529_v0  ;;  %v386_v27 = vpack.c.bf16 %v70_v23, %v69_v22  ;;  %v72_v29 = vld [vmem:[#allocation5 + $0x58] sm:$0xff]  ;;  %v407_v30 = vpack.c.bf16 %v164_v26, %v163_v25  ;;  %v165_v31 = vld [vmem:[#allocation7 + $0x40] sm:$0xff]  ;;  %v166_v32 = vld [vmem:[#allocation7 + $0x48] sm:$0xff] }
  0x3e   :  { %378 = vmatpush3.bf16.msra.mxu0 %v377_v7  ;;  %v389_v33 = vpack.c.bf16 %v72_v29, %v71_v28  ;;  %v73_v34 = vld [vmem:[#allocation5 + $0x60] sm:$0xff]  ;;  %v74_v35 = vld [vmem:[#allocation5 + $0x68] sm:$0xff]  ;;  %v410_v36 = vpack.c.bf16 %v166_v32, %v165_v31  ;;  %v167_v37 = vld [vmem:[#allocation7 + $0x50] sm:$0xff]  ;;  %p504_p0 = pnand %p503_p13, %p497_p10 }
  0x3f   :  { %379 = vmatprep.subr.bf16.mxu0 %v529_v0  ;;  %v168_v38 = vld [vmem:[#allocation7 + $0x58] sm:$0xff]  ;;  %v392_v39 = vpack.c.bf16 %v74_v35, %v73_v34  ;;  %v75_v40 = vld [vmem:[#allocation5 + $0x70] sm:$0xff]  ;;  %v169_v43 = vld [vmem:[#allocation7 + $0x60] sm:$0xff] }
  0x40   :  { %402 = vmatpush3.bf16.msra.mxu1 %v401_v18  ;;  %v76_v41 = vld [vmem:[#allocation5 + $0x78] sm:$0xff]  ;;  %v413_v42 = vpack.c.bf16 %v168_v38, %v167_v37  ;;  %v170_v44 = vld [vmem:[#allocation7 + $0x68] sm:$0xff]  ;;  %v171_v48 = vld [vmem:[#allocation7 + $0x70] sm:$0xff] }
  0x41   :  { %403 = vmatprep.subr.bf16.mxu1 %v529_v0  ;;  %v395_v45 = vpack.c.bf16 %v76_v41, %v75_v40  ;;  %v416_v46 = vpack.c.bf16 %v170_v44, %v169_v43  ;;  %v60_v47 = vld [vmem:[#allocation2] sm:$0xff] }
  0x42   :  { %381 = vmatpush3.bf16.msra.mxu0 %v380_v14  ;;  %v172_v49 = vld [vmem:[#allocation7 + $0x78] sm:$0xff] }
  0x43   :  { %382 = vmatprep.subr.bf16.mxu0 %v529_v0  ;;  %v419_v50 = vpack.c.bf16 %v172_v49, %v171_v48  ;;  %v267_v51 = vld [vmem:[%s641_s2] ss:$0 sm:$0xff] }
  0x44   :  { %405 = vmatpush3.bf16.msra.mxu1 %v404_v24  ;;  %v268_v57 = vld [vmem:[%s643_s4] ss:$0 sm:$0xff] }
  0x45   :  { %406 = vmatprep.subr.bf16.mxu1 %v529_v0 }
  0x46   :  { %384 = vmatpush3.bf16.msra.mxu0 %v383_v21 }
  0x47   :  { %385 = vmatprep.subr.bf16.mxu0 %v529_v0 }
  0x48   :  { %408 = vmatpush3.bf16.msra.mxu1 %v407_v30 }
  0x49   :  { %409 = vmatprep.subr.bf16.mxu1 %v529_v0 }
  0x4a   :  { %387 = vmatpush3.bf16.msra.mxu0 %v386_v27 }
  0x4b   :  { %388 = vmatprep.subr.bf16.mxu0 %v529_v0 }
  0x4c   :  { %411 = vmatpush3.bf16.msra.mxu1 %v410_v36 }
  0x4d   :  { %412 = vmatprep.subr.bf16.mxu1 %v529_v0 }
  0x4e   :  { %390 = vmatpush3.bf16.msra.mxu0 %v389_v33 }
  0x4f   :  { %391 = vmatprep.subr.bf16.mxu0 %v529_v0 }
  0x50   :  { %414 = vmatpush3.bf16.msra.mxu1 %v413_v42 }
  0x51   :  { %415 = vmatprep.subr.bf16.mxu1 %v529_v0 }
  0x52   :  { %393 = vmatpush3.bf16.msra.mxu0 %v392_v39 }
  0x53   :  { %394 = vmatprep.subr.bf16.mxu0 %v529_v0 }
  0x54   :  { %417 = vmatpush3.bf16.msra.mxu1 %v416_v46 }
  0x55   :  { %418 = vmatprep.subr.bf16.mxu1 %v529_v0 }
  0x56   :  { %396 = vmatpush3.bf16.msra.mxu0 %v395_v45 }
  0x58   :  { %420 = vmatpush3.bf16.msra.mxu1 %v419_v50 }
  0x59   :  { %336 = vmatmul.mubr.f32.vlgmr.msra.gmra.mrb[0].mxu0 %v60_v47 }
 0x12c   :  { %v150_v52 = vpop.f32.mrb[0].mxu0 }
 0x12d   :  { %v151_v53 = vadd.f32 %v267_v51, %v150_v52  ;;  %v337_v54 = vpop.f32.mrb[1].mxu0 }
 0x12f   :  { %v155_v55 = vmul.f32 0.2, %v151_v53  ;;  %vm154_vm1 = vcmp.ge.f32.partialorder %v151_v53, 0.0 }
 0x131   :  { %v156_v56 = vsel %vm154_vm1, %v151_v53, %v155_v55 }
 0x132   :  { %371 = vmatmul.mubr.f32.vlgmr.msra.gmra.mrb[0].mxu1 %v156_v56 }
 0x205   :  { %v246_v58 = vpop.f32.mrb[0].mxu1 }
 0x206   :  { %v247_v59 = vadd.f32 %v268_v57, %v246_v58  ;;  %v372_v60 = vpop.f32.mrb[1].mxu1 }
 0x208   :  { %250 = vst [vmem:[#allocation8] sm:$0xff] %v247_v59 }
 0x209   :  { %507 = shalt.err (!%p504_p0)
}
 0x20a   :  { %s508_s11 = scalar_lea.hbm %s644_s5, 128 }
 0x20b   :  { %p509_p1 = scmp.ne.s32.totalorder %s644_s5, %s508_s11  ;;  %p512_p2 = scmp.lt.u32.totalorder %s508_s11, %s644_s5 }
 0x20d   :  { %p514_p3 = pnand %p512_p2, %p509_p1 }
 0x20f   :  { %517 = shalt.err (!%p514_p3)
}
 0x210   :  { %260 = dma.vmem_to_hbm [thread:$0]  %s258_s8, 128, %s644_s5, [#allocation4]  }
 0x211   :  { %522 = dma.done.wait [#allocation4], 128  }
 0x212   :  { %523 = vsyncadd [#allocation4], 4294967168 }
 0x213   :  { %264 = vsyncpa [#allocation3], 1 }
 0x214   :  { %265 = vsyncpa [#allocation6], 1 }
 0x215   :  { %266 = vsyncpa [#allocation4], 1 }

</bundles_post_ra>
